<compile_context>
chip_gen: v7x
topology: tpu7x:2x2x1
jax: 0.10.0
libtpu: 0.0.40
codegen_flags: <defaults>
</compile_context>

<pallas_src>
import jax
import jax.numpy as jnp
from jax.experimental import pallas as pl
from jax.experimental.pallas import tpu as pltpu


def _round_up(x: int, m: int) -> int:
    return ((x + m - 1) // m) * m


def _cdiv(a: int, b: int) -> int:
    return (a + b - 1) // b


def _vmem_capacity_bytes() -> int:
    """Generation-aware VMEM capacity (falls back to v7x's 64 MiB)."""
    try:
        info = pltpu.get_tpu_info()
        for name in ("vmem_capacity_bytes", "vmem_size_bytes", "vmem_bytes"):
            v = getattr(info, name, None)
            if v:
                return int(v)
    except Exception:
        pass
    return 64 * 1024 * 1024


def _step_vmem_bytes(TB, In_p, TH, O_p, out_itemsize, w_bufs) -> int:
    """Rough per-grid-step VMEM footprint estimate."""
    x_bytes = 2 * TB * In_p * 2                       # bf16 x, double-buffered
    w_bytes = w_bufs * (In_p * TH + TH * O_p) * 2     # bf16 weights
    b_bytes = w_bufs * TH * 4 + O_p * 4               # f32 biases
    o_bytes = 2 * TB * O_p * out_itemsize             # double-buffered output
    acc_bytes = TB * O_p * 4                          # f32 accumulator scratch
    tmp_bytes = TB * TH * (4 + 2)                     # f32 h + bf16 copy of h
    return x_bytes + w_bytes + b_bytes + o_bytes + acc_bytes + tmp_bytes


def _mlp_kernel(x_ref, w1_ref, b1_ref, w2_ref, b2_ref, o_ref, acc_ref):
    k = pl.program_id(1)

    @pl.when(k == 0)
    def _():
        acc_ref[...] = jnp.zeros_like(acc_ref)

    # First linear for this H-chunk (bf16 operands, f32 accumulation) + bias + ReLU.
    h = jnp.dot(x_ref[...], w1_ref[...], preferred_element_type=jnp.float32)
    h = jnp.maximum(h + b1_ref[...], 0.0)
    # Second linear: accumulate this H-chunk's contribution in f32.
    acc_ref[...] += jnp.dot(h.astype(jnp.bfloat16), w2_ref[...],
                            preferred_element_type=jnp.float32)

    @pl.when(k == pl.num_programs(1) - 1)
    def _():
        o_ref[...] = jax.nn.sigmoid(acc_ref[...] + b2_ref[...]).astype(o_ref.dtype)


def prepare_params(w1, b1, w2, b2, *, max_tile_batch: int = 512,
                   out_dtype=jnp.float32):
    """One-time (model init) padding + bf16 cast of the weights.

    w1: (In, H), b1: (H,) or (1, H), w2: (H, O), b2: (O,) or (1, O).
    """
    b1 = jnp.asarray(b1).reshape(1, -1)
    b2 = jnp.asarray(b2).reshape(1, -1)
    In, H = w1.shape
    H2, O = w2.shape
    assert H2 == H and b1.shape[1] == H and b2.shape[1] == O

    In_p = _round_up(In, 128)
    O_p = _round_up(O, 128)
    H_p = _round_up(H, 128)

    cap = _vmem_capacity_bytes()
    budget = int(cap * 0.55)
    TB_assumed = _round_up(max(16, min(int(max_tile_batch), 4096)), 16)
    out_itemsize = jnp.dtype(out_dtype).itemsize

    # Pick the hidden-dim chunk TH: keep weights fully resident (single-buffered)
    # when they fit; otherwise stream H in chunks (double-buffered).
    if _step_vmem_bytes(TB_assumed, In_p, H_p, O_p, out_itemsize, w_bufs=1) <= budget:
        TH = H_p
    else:
        TH = H_p
        while TH > 128 and _step_vmem_bytes(
                TB_assumed, In_p, TH, O_p, out_itemsize, w_bufs=2) > budget:
            TH = max(128, _round_up(TH // 2, 128))
    H_p = _round_up(H, TH)  # re-pad so TH divides H_p exactly

    bf16, f32 = jnp.bfloat16, jnp.float32
    w1p = jnp.zeros((In_p, H_p), bf16).at[:In, :H].set(w1.astype(bf16))
    b1p = jnp.zeros((1, H_p), f32).at[:, :H].set(b1.astype(f32))
    w2p = jnp.zeros((H_p, O_p), bf16).at[:H, :O].set(w2.astype(bf16))
    b2p = jnp.zeros((1, O_p), f32).at[:, :O].set(b2.astype(f32))

    return dict(w1p=w1p, b1p=b1p, w2p=w2p, b2p=b2p,
                In=In, H=H, O=O, In_p=In_p, H_p=H_p, O_p=O_p, TH=TH,
                max_tile_batch=TB_assumed, out_dtype=out_dtype, vmem_cap=cap)


def multitask_mlp(x, params):
    """Fused forward: sigmoid(relu(x @ w1 + b1) @ w2 + b2). x: (B, In)."""
    In, O = params["In"], params["O"]
    In_p, H_p, O_p, TH = params["In_p"], params["H_p"], params["O_p"], params["TH"]
    out_dtype = params["out_dtype"]
    max_tile_batch = params["max_tile_batch"]

    B = x.shape[0]
    assert x.shape[1] == In

    # Batch tile: balanced tiles (<= max_tile_batch), rounded to 16 for bf16
    # (16,128) sublane packing; padding waste bounded by < one tile.
    n_bt = _cdiv(B, max_tile_batch)
    TB = _round_up(_cdiv(B, n_bt), 16)
    if _cdiv(B, TB) < 2 and TB >= 32:
        # At least 2 batch grid steps so the "parallel" axis can split across
        # v7x's two TensorCores.
        TB = _round_up(_cdiv(B, 2), 16)
    B_p = _round_up(B, TB)

    bf16 = jnp.bfloat16
    xb = x.astype(bf16)
    if (B_p, In_p) != (B, In):
        xp = jnp.zeros((B_p, In_p), bf16).at[:B, :In].set(xb)
    else:
        xp = xb

    n_b = B_p // TB
    n_k = H_p // TH
    out_itemsize = jnp.dtype(out_dtype).itemsize
    w_bufs = 1 if n_k == 1 else 2
    est = _step_vmem_bytes(TB, In_p, TH, O_p, out_itemsize, w_bufs)
    cap = params["vmem_cap"]
    vmem_limit = int(min(max(2 * est, 16 << 20), int(cap * 0.9)))

    def run(use_buffered_hint: bool):
        # Single-buffer operands whose block never changes over the grid.
        kw_const = {"pipeline_mode": pl.Buffered(1)} if use_buffered_hint else {}
        kw_w = kw_const if n_k == 1 else {}   # weights constant only if H fits in one chunk
        grid_spec = pltpu.PrefetchScalarGridSpec(
            num_scalar_prefetch=0,
            grid=(n_b, n_k),
            in_specs=[
                pl.BlockSpec((TB, In_p), lambda i, k: (i, 0)),           # x: batch-tiled
                pl.BlockSpec((In_p, TH), lambda i, k: (0, k), **kw_w),   # w1: H-chunked
                pl.BlockSpec((1, TH), lambda i, k: (0, k), **kw_w),      # b1: H-chunked
                pl.BlockSpec((TH, O_p), lambda i, k: (k, 0), **kw_w),    # w2: H-chunked
                pl.BlockSpec((1, O_p), lambda i, k: (0, 0), **kw_const), # b2: resident
            ],
            out_specs=pl.BlockSpec((TB, O_p), lambda i, k: (i, 0)),
            scratch_shapes=[pltpu.VMEM((TB, O_p), jnp.float32)],
        )
        return pl.pallas_call(
            _mlp_kernel,
            out_shape=jax.ShapeDtypeStruct((B_p, O_p), out_dtype),
            grid_spec=grid_spec,
            compiler_params=pltpu.CompilerParams(
                dimension_semantics=("parallel", "arbitrary"),
                vmem_limit_bytes=vmem_limit,
            ),
        )(xp, params["w1p"], params["b1p"], params["w2p"], params["b2p"])

    try:
        out_p = jax.block_until_ready(run(use_buffered_hint=True))
    except Exception:
        # Fallback for JAX versions that reject pipeline_mode / Buffered(1).
        out_p = jax.block_until_ready(run(use_buffered_hint=False))

    # TODO(synk): on v5e, consider pl.Buffered(3) on the x spec and bf16 output
    # when downstream tolerates it (HBM-bound regime); and pad 128-wide H/O to
    # 256 on v6e/v7x when the kernel is MXU-bound rather than memory-bound.

    if (B_p, O_p) != (B, O):
        out_p = out_p[:B, :O]
    return out_p


def _reference_f32(x, w1, b1, w2, b2):
    h = jnp.maximum(x @ w1 + b1, 0.0)
    return jax.nn.sigmoid(h @ w2 + b2)


def _reference_bf16_matmul(x, w1, b1, w2, b2):
    # Mirrors the kernel's numerics: bf16 matmul operands, f32 accumulation,
    # f32 bias/activation.
    bf16 = jnp.bfloat16
    h = jnp.dot(x.astype(bf16), w1.astype(bf16),
                preferred_element_type=jnp.float32) + b1
    h = jnp.maximum(h, 0.0)
    y = jnp.dot(h.astype(bf16), w2.astype(bf16),
                preferred_element_type=jnp.float32) + b2
    return jax.nn.sigmoid(y)


if __name__ == "__main__":
    # Small shapes consistent with MultiTaskMLP(input_dim, hidden_dim, output_dim).
    batch, input_dim, hidden_dim, output_dim = 8, 32, 64, 16

    key = jax.random.PRNGKey(0)
    kx, kw1, kb1, kw2, kb2 = jax.random.split(key, 5)

    x = jax.random.normal(kx, (batch, input_dim), dtype=jnp.float32)
    # PyTorch Linear weight is (out, in); we store the transpose (in, out).
    w1 = jax.random.normal(kw1, (input_dim, hidden_dim), dtype=jnp.float32) * 0.1
    b1 = jax.random.normal(kb1, (hidden_dim,), dtype=jnp.float32) * 0.1   # PyTorch-style (H,)
    w2 = jax.random.normal(kw2, (hidden_dim, output_dim), dtype=jnp.float32) * 0.1
    b2 = jax.random.normal(kb2, (output_dim,), dtype=jnp.float32) * 0.1   # PyTorch-style (O,)

    params = prepare_params(w1, b1, w2, b2, max_tile_batch=512)  # one-time init
    out = multitask_mlp(x, params)
    out = jax.block_until_ready(out)

    assert out.shape == (batch, output_dim)
    # Exact numerics check vs. a bf16-operand / f32-accumulate reference.
    ref_bf16 = _reference_bf16_matmul(x, w1, b1, w2, b2)
    assert jnp.allclose(out, ref_bf16, atol=2e-3, rtol=2e-3)
    # Sanity check vs. the pure-f32 PyTorch-equivalent forward (bf16 rounding
    # of operands deviates ~1e-2 relative from PyTorch's f32 path by design).
    ref_f32 = _reference_f32(x, w1, b1, w2, b2)
    assert jnp.allclose(out, ref_f32, atol=5e-2, rtol=5e-2)

    print("KERNEL_OK")
</pallas_src>

<mosaic_0001>
module attributes {stable_mosaic.version = 11 : i64} {
  func.func @_mlp_kernel(%arg0: i32, %arg1: i32, %arg2: memref<16x128xbf16, #tpu.memory_space<vmem>>, %arg3: memref<128x128xbf16, #tpu.memory_space<vmem>>, %arg4: memref<1x128xf32, #tpu.memory_space<vmem>>, %arg5: memref<128x128xbf16, #tpu.memory_space<vmem>>, %arg6: memref<1x128xf32, #tpu.memory_space<vmem>>, %arg7: memref<16x128xf32, #tpu.memory_space<vmem>>, %arg8: memref<16x128xf32, #tpu.memory_space<vmem>>) attributes {dimension_semantics = [#tpu.dimension_semantics<parallel>, #tpu.dimension_semantics<arbitrary>], iteration_bounds = array<i64: 1, 1>, scalar_prefetch = 0 : i64, scratch_operands = 1 : i64, tpu.core_type = #tpu.core_type<tc>, window_params = [{transform_indices = @transform_0, window_bounds = array<i64: 16, 128>}, {pipeline_mode = #tpu.pipeline_mode<synchronous>, transform_indices = @transform_1, window_bounds = array<i64: 128, 128>}, {pipeline_mode = #tpu.pipeline_mode<synchronous>, transform_indices = @transform_2, window_bounds = array<i64: 1, 128>}, {pipeline_mode = #tpu.pipeline_mode<synchronous>, transform_indices = @transform_3, window_bounds = array<i64: 128, 128>}, {pipeline_mode = #tpu.pipeline_mode<synchronous>, transform_indices = @transform_4, window_bounds = array<i64: 1, 128>}, {transform_indices = @transform_5, window_bounds = array<i64: 16, 128>}]} {
    %c0_i32 = arith.constant 0 : i32
    %0 = arith.cmpi eq, %arg1, %c0_i32 : i32
    %1 = arith.extui %0 : i1 to i32
    %c0_i32_0 = arith.constant 0 : i32
    %2 = arith.cmpi ne, %1, %c0_i32_0 : i32
    scf.if %2 {
      %cst_16 = arith.constant 0.000000e+00 : f32
      %20 = vector.broadcast %cst_16 : f32 to vector<16x128xf32>
      %c0_17 = arith.constant 0 : index
      %c0_18 = arith.constant 0 : index
      %21 = vector.load %arg8[%c0_17, %c0_18] : memref<16x128xf32, #tpu.memory_space<vmem>>, vector<16x128xf32>
      tpu.vector_store %arg8[%c0_17, %c0_18], %20 {strides = array<i32>} : memref<16x128xf32, #tpu.memory_space<vmem>>, vector<16x128xf32>,
    } else {
    }
    %c0 = arith.constant 0 : index
    %c0_1 = arith.constant 0 : index
    %3 = vector.load %arg2[%c0, %c0_1] : memref<16x128xbf16, #tpu.memory_space<vmem>>, vector<16x128xbf16>
    %c0_2 = arith.constant 0 : index
    %c0_3 = arith.constant 0 : index
    %4 = vector.load %arg3[%c0_2, %c0_3] : memref<128x128xbf16, #tpu.memory_space<vmem>>, vector<128x128xbf16>
    %cst = arith.constant dense<0.000000e+00> : vector<16x128xf32>
    %5 = tpu.matmul %3, %4, %cst {dimension_numbers = #tpu.dot_dimension_numbers<[1], [0], [0], [1], [0, 0, 1, 1], [], []>} : vector<16x128xbf16>, vector<128x128xbf16>, vector<16x128xf32> -> vector<16x128xf32>
    %c0_4 = arith.constant 0 : index
    %c0_5 = arith.constant 0 : index
    %6 = vector.load %arg4[%c0_4, %c0_5] : memref<1x128xf32, #tpu.memory_space<vmem>>, vector<1x128xf32>
    %7 = vector.broadcast %6 : vector<1x128xf32> to vector<16x128xf32>
    %8 = arith.addf %5, %7 : vector<16x128xf32>
    %cst_6 = arith.constant 0.000000e+00 : f32
    %9 = vector.broadcast %cst_6 : f32 to vector<16x128xf32>
    %10 = arith.maximumf %8, %9 : vector<16x128xf32>
    %c0_7 = arith.constant 0 : index
    %c0_8 = arith.constant 0 : index
    %11 = vector.load %arg8[%c0_7, %c0_8] : memref<16x128xf32, #tpu.memory_space<vmem>>, vector<16x128xf32>
    %12 = arith.truncf %10 : vector<16x128xf32> to vector<16x128xbf16>
    %c0_9 = arith.constant 0 : index
    %c0_10 = arith.constant 0 : index
    %13 = vector.load %arg5[%c0_9, %c0_10] : memref<128x128xbf16, #tpu.memory_space<vmem>>, vector<128x128xbf16>
    %cst_11 = arith.constant dense<0.000000e+00> : vector<16x128xf32>
    %14 = tpu.matmul %12, %13, %cst_11 {dimension_numbers = #tpu.dot_dimension_numbers<[1], [0], [0], [1], [0, 0, 1, 1], [], []>} : vector<16x128xbf16>, vector<128x128xbf16>, vector<16x128xf32> -> vector<16x128xf32>
    %15 = arith.addf %11, %14 : vector<16x128xf32>
    %c0_12 = arith.constant 0 : index
    %c0_13 = arith.constant 0 : index
    %16 = vector.load %arg8[%c0_12, %c0_13] : memref<16x128xf32, #tpu.memory_space<vmem>>, vector<16x128xf32>
    tpu.vector_store %arg8[%c0_12, %c0_13], %15 {strides = array<i32>} : memref<16x128xf32, #tpu.memory_space<vmem>>, vector<16x128xf32>,
    %c0_i32_14 = arith.constant 0 : i32
    %17 = arith.cmpi eq, %arg1, %c0_i32_14 : i32
    %18 = arith.extui %17 : i1 to i32
    %c0_i32_15 = arith.constant 0 : i32
    %19 = arith.cmpi ne, %18, %c0_i32_15 : i32
    scf.if %19 {
      %c0_16 = arith.constant 0 : index
      %c0_17 = arith.constant 0 : index
      %20 = vector.load %arg8[%c0_16, %c0_17] : memref<16x128xf32, #tpu.memory_space<vmem>>, vector<16x128xf32>
      %c0_18 = arith.constant 0 : index
      %c0_19 = arith.constant 0 : index
      %21 = vector.load %arg6[%c0_18, %c0_19] : memref<1x128xf32, #tpu.memory_space<vmem>>, vector<1x128xf32>
      %22 = vector.broadcast %21 : vector<1x128xf32> to vector<16x128xf32>
      %23 = arith.addf %20, %22 : vector<16x128xf32>
      %24 = arith.negf %23 : vector<16x128xf32>
      %25 = math.exp %24 : vector<16x128xf32>
      %cst_20 = arith.constant 1.000000e+00 : f32
      %26 = vector.broadcast %cst_20 : f32 to vector<16x128xf32>
      %27 = arith.addf %26, %25 : vector<16x128xf32>
      %28 = arith.divf %26, %27 : vector<16x128xf32>
      %c0_21 = arith.constant 0 : index
      %c0_22 = arith.constant 0 : index
      %29 = vector.load %arg7[%c0_21, %c0_22] : memref<16x128xf32, #tpu.memory_space<vmem>>, vector<16x128xf32>
      tpu.vector_store %arg7[%c0_21, %c0_22], %28 {strides = array<i32>} : memref<16x128xf32, #tpu.memory_space<vmem>>, vector<16x128xf32>,
    } else {
    }
    return
  }
  func.func @transform_0(%arg0: i32, %arg1: i32) -> (i32, i32) {
    %c0_i32 = arith.constant 0 : i32
    %c0_i32_0 = arith.constant 0 : i32
    return %arg0, %c0_i32 : i32, i32
  }
  func.func @transform_1(%arg0: i32, %arg1: i32) -> (i32, i32) {
    %c0_i32 = arith.constant 0 : i32
    %c0_i32_0 = arith.constant 0 : i32
    return %c0_i32, %arg1 : i32, i32
  }
  func.func @transform_2(%arg0: i32, %arg1: i32) -> (i32, i32) {
    %c0_i32 = arith.constant 0 : i32
    %c0_i32_0 = arith.constant 0 : i32
    return %c0_i32, %arg1 : i32, i32
  }
  func.func @transform_3(%arg0: i32, %arg1: i32) -> (i32, i32) {
    %c0_i32 = arith.constant 0 : i32
    %c0_i32_0 = arith.constant 0 : i32
    return %arg1, %c0_i32 : i32, i32
  }
  func.func @transform_4(%arg0: i32, %arg1: i32) -> (i32, i32) {
    %c0_i32 = arith.constant 0 : i32
    %c0_i32_0 = arith.constant 0 : i32
    %c0_i32_1 = arith.constant 0 : i32
    return %c0_i32, %c0_i32_0 : i32, i32
  }
  func.func @transform_5(%arg0: i32, %arg1: i32) -> (i32, i32) {
    %c0_i32 = arith.constant 0 : i32
    %c0_i32_0 = arith.constant 0 : i32
    return %arg0, %c0_i32 : i32, i32
  }
}

module attributes {stable_mosaic.version = 11 : i64} {
  func.func @_mlp_kernel(%arg0: i32, %arg1: i32, %arg2: memref<16x128xbf16, #tpu.memory_space<vmem>>, %arg3: memref<128x128xbf16, #tpu.memory_space<vmem>>, %arg4: memref<1x128xf32, #tpu.memory_space<vmem>>, %arg5: memref<128x128xbf16, #tpu.memory_space<vmem>>, %arg6: memref<1x128xf32, #tpu.memory_space<vmem>>, %arg7: memref<16x128xf32, #tpu.memory_space<vmem>>, %arg8: memref<16x128xf32, #tpu.memory_space<vmem>>) attributes {dimension_semantics = [#tpu.dimension_semantics<parallel>, #tpu.dimension_semantics<arbitrary>], iteration_bounds = array<i64: 1, 1>, scalar_prefetch = 0 : i64, scratch_operands = 1 : i64, tpu.core_type = #tpu.core_type<tc>, window_params = [{transform_indices = @transform_0, window_bounds = array<i64: 16, 128>}, {transform_indices = @transform_1, window_bounds = array<i64: 128, 128>}, {transform_indices = @transform_2, window_bounds = array<i64: 1, 128>}, {transform_indices = @transform_3, window_bounds = array<i64: 128, 128>}, {pipeline_mode = #tpu.pipeline_mode<synchronous>, transform_indices = @transform_4, window_bounds = array<i64: 1, 128>}, {transform_indices = @transform_5, window_bounds = array<i64: 16, 128>}]} {
    %c0_i32 = arith.constant 0 : i32
    %0 = arith.cmpi eq, %arg1, %c0_i32 : i32
    %1 = arith.extui %0 : i1 to i32
    %c0_i32_0 = arith.constant 0 : i32
    %2 = arith.cmpi ne, %1, %c0_i32_0 : i32
    scf.if %2 {
      %cst_16 = arith.constant 0.000000e+00 : f32
      %20 = vector.broadcast %cst_16 : f32 to vector<16x128xf32>
      %c0_17 = arith.constant 0 : index
      %c0_18 = arith.constant 0 : index
      %21 = vector.load %arg8[%c0_17, %c0_18] : memref<16x128xf32, #tpu.memory_space<vmem>>, vector<16x128xf32>
      tpu.vector_store %arg8[%c0_17, %c0_18], %20 {strides = array<i32>} : memref<16x128xf32, #tpu.memory_space<vmem>>, vector<16x128xf32>,
    } else {
    }
    %c0 = arith.constant 0 : index
    %c0_1 = arith.constant 0 : index
    %3 = vector.load %arg2[%c0, %c0_1] : memref<16x128xbf16, #tpu.memory_space<vmem>>, vector<16x128xbf16>
    %c0_2 = arith.constant 0 : index
    %c0_3 = arith.constant 0 : index
    %4 = vector.load %arg3[%c0_2, %c0_3] : memref<128x128xbf16, #tpu.memory_space<vmem>>, vector<128x128xbf16>
    %cst = arith.constant dense<0.000000e+00> : vector<16x128xf32>
    %5 = tpu.matmul %3, %4, %cst {dimension_numbers = #tpu.dot_dimension_numbers<[1], [0], [0], [1], [0, 0, 1, 1], [], []>} : vector<16x128xbf16>, vector<128x128xbf16>, vector<16x128xf32> -> vector<16x128xf32>
    %c0_4 = arith.constant 0 : index
    %c0_5 = arith.constant 0 : index
    %6 = vector.load %arg4[%c0_4, %c0_5] : memref<1x128xf32, #tpu.memory_space<vmem>>, vector<1x128xf32>
    %7 = vector.broadcast %6 : vector<1x128xf32> to vector<16x128xf32>
    %8 = arith.addf %5, %7 : vector<16x128xf32>
    %cst_6 = arith.constant 0.000000e+00 : f32
    %9 = vector.broadcast %cst_6 : f32 to vector<16x128xf32>
    %10 = arith.maximumf %8, %9 : vector<16x128xf32>
    %c0_7 = arith.constant 0 : index
    %c0_8 = arith.constant 0 : index
    %11 = vector.load %arg8[%c0_7, %c0_8] : memref<16x128xf32, #tpu.memory_space<vmem>>, vector<16x128xf32>
    %12 = arith.truncf %10 : vector<16x128xf32> to vector<16x128xbf16>
    %c0_9 = arith.constant 0 : index
    %c0_10 = arith.constant 0 : index
    %13 = vector.load %arg5[%c0_9, %c0_10] : memref<128x128xbf16, #tpu.memory_space<vmem>>, vector<128x128xbf16>
    %cst_11 = arith.constant dense<0.000000e+00> : vector<16x128xf32>
    %14 = tpu.matmul %12, %13, %cst_11 {dimension_numbers = #tpu.dot_dimension_numbers<[1], [0], [0], [1], [0, 0, 1, 1], [], []>} : vector<16x128xbf16>, vector<128x128xbf16>, vector<16x128xf32> -> vector<16x128xf32>
    %15 = arith.addf %11, %14 : vector<16x128xf32>
    %c0_12 = arith.constant 0 : index
    %c0_13 = arith.constant 0 : index
    %16 = vector.load %arg8[%c0_12, %c0_13] : memref<16x128xf32, #tpu.memory_space<vmem>>, vector<16x128xf32>
    tpu.vector_store %arg8[%c0_12, %c0_13], %15 {strides = array<i32>} : memref<16x128xf32, #tpu.memory_space<vmem>>, vector<16x128xf32>,
    %c0_i32_14 = arith.constant 0 : i32
    %17 = arith.cmpi eq, %arg1, %c0_i32_14 : i32
    %18 = arith.extui %17 : i1 to i32
    %c0_i32_15 = arith.constant 0 : i32
    %19 = arith.cmpi ne, %18, %c0_i32_15 : i32
    scf.if %19 {
      %c0_16 = arith.constant 0 : index
      %c0_17 = arith.constant 0 : index
      %20 = vector.load %arg8[%c0_16, %c0_17] : memref<16x128xf32, #tpu.memory_space<vmem>>, vector<16x128xf32>
      %c0_18 = arith.constant 0 : index
      %c0_19 = arith.constant 0 : index
      %21 = vector.load %arg6[%c0_18, %c0_19] : memref<1x128xf32, #tpu.memory_space<vmem>>, vector<1x128xf32>
      %22 = vector.broadcast %21 : vector<1x128xf32> to vector<16x128xf32>
      %23 = arith.addf %20, %22 : vector<16x128xf32>
      %24 = arith.negf %23 : vector<16x128xf32>
      %25 = math.exp %24 : vector<16x128xf32>
      %cst_20 = arith.constant 1.000000e+00 : f32
      %26 = vector.broadcast %cst_20 : f32 to vector<16x128xf32>
      %27 = arith.addf %26, %25 : vector<16x128xf32>
      %28 = arith.divf %26, %27 : vector<16x128xf32>
      %c0_21 = arith.constant 0 : index
      %c0_22 = arith.constant 0 : index
      %29 = vector.load %arg7[%c0_21, %c0_22] : memref<16x128xf32, #tpu.memory_space<vmem>>, vector<16x128xf32>
      tpu.vector_store %arg7[%c0_21, %c0_22], %28 {strides = array<i32>} : memref<16x128xf32, #tpu.memory_space<vmem>>, vector<16x128xf32>,
    } else {
    }
    return
  }
  func.func @transform_0(%arg0: i32, %arg1: i32) -> (i32, i32) {
    %c0_i32 = arith.constant 0 : i32
    %c0_i32_0 = arith.constant 0 : i32
    return %arg0, %c0_i32 : i32, i32
  }
  func.func @transform_1(%arg0: i32, %arg1: i32) -> (i32, i32) {
    %c0_i32 = arith.constant 0 : i32
    %c0_i32_0 = arith.constant 0 : i32
    return %c0_i32, %arg1 : i32, i32
  }
  func.func @transform_2(%arg0: i32, %arg1: i32) -> (i32, i32) {
    %c0_i32 = arith.constant 0 : i32
    %c0_i32_0 = arith.constant 0 : i32
    return %c0_i32, %arg1 : i32, i32
  }
  func.func @transform_3(%arg0: i32, %arg1: i32) -> (i32, i32) {
    %c0_i32 = arith.constant 0 : i32
    %c0_i32_0 = arith.constant 0 : i32
    return %arg1, %c0_i32 : i32, i32
  }
  func.func @transform_4(%arg0: i32, %arg1: i32) -> (i32, i32) {
    %c0_i32 = arith.constant 0 : i32
    %c0_i32_0 = arith.constant 0 : i32
    %c0_i32_1 = arith.constant 0 : i32
    return %c0_i32, %c0_i32_0 : i32, i32
  }
  func.func @transform_5(%arg0: i32, %arg1: i32) -> (i32, i32) {
    %c0_i32 = arith.constant 0 : i32
    %c0_i32_0 = arith.constant 0 : i32
    return %arg0, %c0_i32 : i32, i32
  }
}

</mosaic_0001>

<bundles_post_ra>
// kernel: tpu_custom_call.1
= control target key start
LH: loop header
LB: loop body
LE: loop exit
PB: predicated region body
PF: predicated region fallthrough
CT: control target
= control target key end

     0   :  { %10 = vsyncpa [#allocation4], 0  ;;  %s667_s0 = inlined_call_operand.hbm [shape: bf16[16,128], index: 0, kind: input, shape index: {}]   ;;  %s668_s1 = inlined_call_operand.hbm [shape: bf16[128,128], index: 1, kind: input, shape index: {}]   ;;  %s669_s2 = inlined_call_operand.vmem [shape: f32[1,128], index: 2, kind: input, shape index: {}]   ;;  %s670_s3 = inlined_call_operand.hbm [shape: bf16[128,128], index: 3, kind: input, shape index: {}]   ;;  %s671_s4 = inlined_call_operand.vmem [shape: f32[1,128], index: 4, kind: input, shape index: {}]   ;;  %s672_s5 = inlined_call_operand.hbm [shape: f32[16,128], index: 5, kind: output, shape index: {}]  }
   0x1   :  { %11 = vsyncpa [#allocation7], 0 }
   0x2   :  { %12 = vsyncpa [#allocation5], 0  ;;  %s557_s18 = smov [#allocation6]   ;;  %s558_s20 = smov [#allocation3]  }
   0x3   :  { %s30_s19 = sshll.u32 %s557_s18, 4  ;;  %s18_s21 = sshll.u32 %s558_s20, 4  ;;  %s31_s19 = int_to_ptr.vmem [resolvable:$true] %s30_s19  ;;  %s597_s21 = int_to_ptr.vmem [resolvable:$true] %s18_s21 }
   0x4   :  { %s463_s24 = scalar_lea.hbm %s668_s1, 1024 }
   0x5   :  { %p464_p0 = scmp.ne.s32.totalorder %s668_s1, %s463_s24  ;;  %p467_p1 = scmp.lt.u32.totalorder %s463_s24, %s668_s1 }
   0x7   :  { %p469_p2 = pnand %p467_p1, %p464_p0 }
   0x9   :  { %472 = shalt.err (!%p469_p2)
}
   0xa   :  { %s473_s29 = scalar_lea.vmem %s31_s19, 1024  ;;  %p478_p4 = scmp.lt.s32.totalorder %s31_s19, %s31_s19 }
   0xb   :  { %p474_p3 = scmp.ne.s32.totalorder %s31_s19, %s473_s29  ;;  %p479_p5 = scmp.lt.s32.totalorder %s473_s29, %s473_s29 }
   0xd   :  { %p480_p6 = por %p479_p5, %p478_p4 }
   0xf   :  { %p481_p7 = pnand %p480_p6, %p474_p3 }
  0x11   :  { %484 = shalt.err (!%p481_p7)
}
  0x12   :  { %s559_s30 = smov 64   ;;  %s560_s6 = smov 4  }
  0x13   :  { %36 = dma.hbm_to_vmem [thread:$0]  %s668_s1, 1024, %s31_s19, [#allocation7], %s559_s30, %s559_s30, %s560_s6  }
  0x14   :  { %s485_s11 = scalar_lea.hbm %s667_s0, 128 }
  0x15   :  { %p486_p8 = scmp.ne.s32.totalorder %s667_s0, %s485_s11  ;;  %p489_p9 = scmp.lt.u32.totalorder %s485_s11, %s667_s0 }
  0x17   :  { %p491_p10 = pnand %p489_p9, %p486_p8 }
  0x19   :  { %494 = shalt.err (!%p491_p10)
}
  0x1a   :  { %s495_s16 = scalar_lea.vmem %s597_s21, 128  ;;  %p500_p12 = scmp.lt.s32.totalorder %s597_s21, %s597_s21 }
  0x1b   :  { %p496_p11 = scmp.ne.s32.totalorder %s597_s21, %s495_s16  ;;  %p501_p13 = scmp.lt.s32.totalorder %s495_s16, %s495_s16 }
  0x1d   :  { %p502_p0 = por %p501_p13, %p500_p12 }
  0x1f   :  { %p503_p1 = pnand %p502_p0, %p496_p11 }
  0x21   :  { %506 = shalt.err (!%p503_p1)
}
  0x22   :  { %24 = dma.hbm_to_vmem [thread:$0]  %s667_s0, 128, %s597_s21, [#allocation4], %s559_s30, %s559_s30, %s560_s6  }
  0x23   :  { %s561_s18 = smov [#allocation8]   ;;  %s507_s23 = scalar_lea.hbm %s670_s3, 1024 }
  0x24   :  { %s44_s19 = sshll.u32 %s561_s18, 4  ;;  %p508_p2 = scmp.ne.s32.totalorder %s670_s3, %s507_s23  ;;  %s45_s19 = int_to_ptr.vmem [resolvable:$true] %s44_s19 }
  0x25   :  { %p511_p3 = scmp.lt.u32.totalorder %s507_s23, %s670_s3 }
  0x27   :  { %p513_p4 = pnand %p511_p3, %p508_p2 }
  0x29   :  { %516 = shalt.err (!%p513_p4)
}
  0x2a   :  { %s517_s28 = scalar_lea.vmem %s45_s19, 1024  ;;  %p522_p6 = scmp.lt.s32.totalorder %s45_s19, %s45_s19 }
  0x2b   :  { %p518_p5 = scmp.ne.s32.totalorder %s45_s19, %s517_s28  ;;  %p523_p7 = scmp.lt.s32.totalorder %s517_s28, %s517_s28 }
  0x2d   :  { %p524_p8 = por %p523_p7, %p522_p6 }
  0x2f   :  { %p525_p9 = pnand %p524_p8, %p518_p5 }
  0x31   :  { %528 = shalt.err (!%p525_p9)
}
  0x32   :  { %50 = dma.hbm_to_vmem [thread:$0]  %s670_s3, 1024, %s45_s19, [#allocation7], %s559_s30, %s559_s30, %s560_s6  }
  0x33   :  { %551 = dma.done.wait [#allocation4], 128  }
  0x34   :  { %552 = vsyncadd [#allocation4], 4294967168 }
  0x35   :  { %553 = dma.done.wait [#allocation7], 2048  }
  0x36   :  { %554 = vsyncadd [#allocation7], 4294965248  ;;  %v562_v0 = vmov 0.0   ;;  %vm563_vm0 = vmmov 0   ;;  %v438_v1 = vld [vmem:[#allocation6] sm:$0xff]   ;;  %v439_v2 = vld [vmem:[#allocation6 + $0x8] sm:$0xff]  }
  0x37   :  { %388 = vmatprep.subr.bf16.mxu0 %v562_v0  ;;  %404 = vmatprep.mubr.msk.bf16.mxu0 %vm563_vm0, %v562_v0  ;;  %v440_v3 = vld [vmem:[#allocation6 + $0x10] sm:$0xff]   ;;  %v447_v4 = vld [vmem:[#allocation8] sm:$0xff]   ;;  %v441_v5 = vld [vmem:[#allocation6 + $0x18] sm:$0xff]  }
  0x38   :  { %408 = vmatprep.subr.bf16.mxu1 %v562_v0  ;;  %424 = vmatprep.mubr.msk.bf16.mxu1 %vm563_vm0, %v562_v0  ;;  %v448_v6 = vld [vmem:[#allocation8 + $0x8] sm:$0xff]   ;;  %v442_v7 = vld [vmem:[#allocation6 + $0x20] sm:$0xff]   ;;  %v449_v8 = vld [vmem:[#allocation8 + $0x10] sm:$0xff]  }
  0x39   :  { %389 = vmatpush3.bf16.msra.mxu0 %v438_v1  ;;  %409 = vmatpush3.bf16.msra.mxu1 %v447_v4  ;;  %v443_v9 = vld [vmem:[#allocation6 + $0x28] sm:$0xff]   ;;  %v450_v10 = vld [vmem:[#allocation8 + $0x18] sm:$0xff]   ;;  %v444_v11 = vld [vmem:[#allocation6 + $0x30] sm:$0xff]  }
  0x3a   :  { %390 = vmatprep.subr.bf16.mxu0 %v562_v0  ;;  %410 = vmatprep.subr.bf16.mxu1 %v562_v0  ;;  %v451_v12 = vld [vmem:[#allocation8 + $0x20] sm:$0xff]   ;;  %v445_v13 = vld [vmem:[#allocation6 + $0x38] sm:$0xff]   ;;  %v452_v14 = vld [vmem:[#allocation8 + $0x28] sm:$0xff]  }
  0x3b   :  { %v446_v15 = vld [vmem:[#allocation3] sm:$0xff]   ;;  %v453_v16 = vld [vmem:[#allocation8 + $0x30] sm:$0xff]  }
  0x3c   :  { %v454_v17 = vld [vmem:[#allocation8 + $0x38] sm:$0xff]  }
  0x3d   :  { %391 = vmatpush3.bf16.msra.mxu0 %v439_v2  ;;  %411 = vmatpush3.bf16.msra.mxu1 %v448_v6  ;;  %v349_v18 = vld [vmem:[%s669_s2] ss:$0 sm:$0xff]  ;;  %s564_s2 = smov [#allocation9]  }
  0x3e   :  { %392 = vmatprep.subr.bf16.mxu0 %v562_v0  ;;  %412 = vmatprep.subr.bf16.mxu1 %v562_v0  ;;  %v367_v28 = vld [vmem:[%s671_s4] ss:$0 sm:$0xff]  ;;  %s336_s7 = sshll.u32 %s564_s2, 4  ;;  %s337_s7 = int_to_ptr.vmem [resolvable:$true] %s336_s7 }
  0x3f   :  { %s529_s4 = scalar_lea.vmem %s337_s7, 256  ;;  %p534_p11 = scmp.lt.s32.totalorder %s337_s7, %s337_s7 }
  0x40   :  { %p530_p10 = scmp.ne.s32.totalorder %s337_s7, %s529_s4  ;;  %p535_p12 = scmp.lt.s32.totalorder %s529_s4, %s529_s4 }
  0x41   :  { %393 = vmatpush3.bf16.msra.mxu0 %v440_v3  ;;  %413 = vmatpush3.bf16.msra.mxu1 %v449_v8 }
  0x42   :  { %394 = vmatprep.subr.bf16.mxu0 %v562_v0  ;;  %414 = vmatprep.subr.bf16.mxu1 %v562_v0  ;;  %p536_p13 = por %p535_p12, %p534_p11 }
  0x44   :  { %p537_p0 = pnand %p536_p13, %p530_p10 }
  0x45   :  { %395 = vmatpush3.bf16.msra.mxu0 %v441_v5  ;;  %415 = vmatpush3.bf16.msra.mxu1 %v450_v10 }
  0x46   :  { %396 = vmatprep.subr.bf16.mxu0 %v562_v0  ;;  %416 = vmatprep.subr.bf16.mxu1 %v562_v0 }
  0x49   :  { %397 = vmatpush3.bf16.msra.mxu0 %v442_v7  ;;  %417 = vmatpush3.bf16.msra.mxu1 %v451_v12 }
  0x4a   :  { %398 = vmatprep.subr.bf16.mxu0 %v562_v0  ;;  %418 = vmatprep.subr.bf16.mxu1 %v562_v0 }
  0x4d   :  { %399 = vmatpush3.bf16.msra.mxu0 %v443_v9  ;;  %419 = vmatpush3.bf16.msra.mxu1 %v452_v14 }
  0x4e   :  { %400 = vmatprep.subr.bf16.mxu0 %v562_v0  ;;  %420 = vmatprep.subr.bf16.mxu1 %v562_v0 }
  0x51   :  { %401 = vmatpush3.bf16.msra.mxu0 %v444_v11  ;;  %421 = vmatpush3.bf16.msra.mxu1 %v453_v16 }
  0x52   :  { %402 = vmatprep.subr.bf16.mxu0 %v562_v0  ;;  %422 = vmatprep.subr.bf16.mxu1 %v562_v0 }
  0x55   :  { %403 = vmatpush3.bf16.msra.mxu0 %v445_v13  ;;  %423 = vmatpush3.bf16.msra.mxu1 %v454_v17 }
  0x58   :  { %405 = vmatmul.mubr.bf16.vlgmr.msra.gmra.mrb[0].mxu0 %v446_v15 }
 0x12b   :  { %v182_v19 = vpop.f32.mrb[0].mxu0 }
 0x12c   :  { %v183_v20 = vadd.f32 %v349_v18, %v182_v19  ;;  %v406_v21 = vpop.f32.mrb[1].mxu0 }
 0x12d   :  { %v185_v22 = vpop.f32.mrb[2].mxu0 }
 0x12e   :  { %v186_v23 = vadd.f32 %v349_v18, %v185_v22  ;;  %v407_v24 = vpop.f32.mrb[3].mxu0  ;;  %v189_v25 = vmax.f32 %v183_v20, 0.0 }
 0x130   :  { %v190_v26 = vmax.f32 %v186_v23, 0.0 }
 0x132   :  { %v193_v27 = vpack.c.bf16 %v190_v26, %v189_v25 }
 0x134   :  { %425 = vmatmul.mubr.bf16.vlgmr.msra.gmra.mrb[0].mxu1 %v193_v27 }
 0x207   :  { %v292_v29 = vpop.f32.mrb[0].mxu1 }
 0x208   :  { %v315_v30 = vadd.f32 %v367_v28, %v292_v29  ;;  %v426_v31 = vpop.f32.mrb[1].mxu1 }
 0x209   :  { %v295_v32 = vpop.f32.mrb[2].mxu1 }
 0x20a   :  { %v368_v33 = vmul.f32 -1.442695, %v315_v30  ;;  %v316_v34 = vadd.f32 %v367_v28, %v295_v32  ;;  %v427_v35 = vpop.f32.mrb[3].mxu1 }
 0x20c   :  { %455 = vpow2.f32 %v368_v33  ;;  %v369_v36 = vmul.f32 -1.442695, %v316_v34 }
 0x20e   :  { %457 = vpow2.f32 %v369_v36 }
 0x216   :  { %v456_v37 = vpop.eup %455 }
 0x217   :  { %v323_v38 = vadd.f32 1.0, %v456_v37 }
 0x218   :  { %v458_v39 = vpop.eup %457 }
 0x219   :  { %459 = vrcp.f32 %v323_v38  ;;  %v324_v40 = vadd.f32 1.0, %v458_v39 }
 0x21b   :  { %461 = vrcp.f32 %v324_v40 }
 0x223   :  { %v460_v41 = vpop.eup %459 }
 0x224   :  { %329 = vst [vmem:[#allocation9] sm:$0xff] %v460_v41 }
 0x225   :  { %v462_v42 = vpop.eup %461 }
 0x226   :  { %330 = vst [vmem:[#allocation9 + $0x8] sm:$0xff] %v462_v42 }
 0x227   :  { %540 = shalt.err (!%p537_p0)
}
 0x228   :  { %s541_s10 = scalar_lea.hbm %s672_s5, 256 }
 0x229   :  { %p542_p1 = scmp.ne.s32.totalorder %s672_s5, %s541_s10  ;;  %p545_p2 = scmp.lt.u32.totalorder %s541_s10, %s672_s5 }
 0x22b   :  { %p547_p3 = pnand %p545_p2, %p542_p1 }
 0x22d   :  { %550 = shalt.err (!%p547_p3)
}
 0x22e   :  { %s565_s15 = smov 128   ;;  %s566_s16 = smov 8  }
 0x22f   :  { %342 = dma.vmem_to_hbm [thread:$0]  %s337_s7, 256, %s672_s5, [#allocation5], %s565_s15, %s565_s15, %s566_s16  }
 0x230   :  { %555 = dma.done.wait [#allocation5], 256  }
 0x231   :  { %556 = vsyncadd [#allocation5], 4294967040 }
 0x232   :  { %346 = vsyncpa [#allocation4], 1 }
 0x233   :  { %347 = vsyncpa [#allocation7], 1 }
 0x234   :  { %348 = vsyncpa [#allocation5], 1 }

// kernel: tpu_custom_call.1
= control target key start
LH: loop header
LB: loop body
LE: loop exit
PB: predicated region body
PF: predicated region fallthrough
CT: control target
= control target key end

     0   :  { %10 = vsyncpa [#allocation4], 0  ;;  %s667_s0 = inlined_call_operand.hbm [shape: bf16[16,128], index: 0, kind: input, shape index: {}]   ;;  %s668_s1 = inlined_call_operand.hbm [shape: bf16[128,128], index: 1, kind: input, shape index: {}]   ;;  %s669_s2 = inlined_call_operand.vmem [shape: f32[1,128], index: 2, kind: input, shape index: {}]   ;;  %s670_s3 = inlined_call_operand.hbm [shape: bf16[128,128], index: 3, kind: input, shape index: {}]   ;;  %s671_s4 = inlined_call_operand.vmem [shape: f32[1,128], index: 4, kind: input, shape index: {}]   ;;  %s672_s5 = inlined_call_operand.hbm [shape: f32[16,128], index: 5, kind: output, shape index: {}]  }
   0x1   :  { %11 = vsyncpa [#allocation7], 0 }
   0x2   :  { %12 = vsyncpa [#allocation5], 0  ;;  %s557_s18 = smov [#allocation6]   ;;  %s558_s20 = smov [#allocation3]  }
   0x3   :  { %s30_s19 = sshll.u32 %s557_s18, 4  ;;  %s18_s21 = sshll.u32 %s558_s20, 4  ;;  %s31_s19 = int_to_ptr.vmem [resolvable:$true] %s30_s19  ;;  %s597_s21 = int_to_ptr.vmem [resolvable:$true] %s18_s21 }
   0x4   :  { %s463_s24 = scalar_lea.hbm %s668_s1, 1024 }
   0x5   :  { %p464_p0 = scmp.ne.s32.totalorder %s668_s1, %s463_s24  ;;  %p467_p1 = scmp.lt.u32.totalorder %s463_s24, %s668_s1 }
   0x7   :  { %p469_p2 = pnand %p467_p1, %p464_p0 }
   0x9   :  { %472 = shalt.err (!%p469_p2)
}
   0xa   :  { %s473_s29 = scalar_lea.vmem %s31_s19, 1024  ;;  %p478_p4 = scmp.lt.s32.totalorder %s31_s19, %s31_s19 }
   0xb   :  { %p474_p3 = scmp.ne.s32.totalorder %s31_s19, %s473_s29  ;;  %p479_p5 = scmp.lt.s32.totalorder %s473_s29, %s473_s29 }
   0xd   :  { %p480_p6 = por %p479_p5, %p478_p4 }
   0xf   :  { %p481_p7 = pnand %p480_p6, %p474_p3 }
  0x11   :  { %484 = shalt.err (!%p481_p7)
}
  0x12   :  { %s559_s30 = smov 64   ;;  %s560_s6 = smov 4  }
  0x13   :  { %36 = dma.hbm_to_vmem [thread:$0]  %s668_s1, 1024, %s31_s19, [#allocation7], %s559_s30, %s559_s30, %s560_s6  }
  0x14   :  { %s485_s11 = scalar_lea.hbm %s667_s0, 128 }
  0x15   :  { %p486_p8 = scmp.ne.s32.totalorder %s667_s0, %s485_s11  ;;  %p489_p9 = scmp.lt.u32.totalorder %s485_s11, %s667_s0 }
  0x17   :  { %p491_p10 = pnand %p489_p9, %p486_p8 }
  0x19   :  { %494 = shalt.err (!%p491_p10)
}
  0x1a   :  { %s495_s16 = scalar_lea.vmem %s597_s21, 128  ;;  %p500_p12 = scmp.lt.s32.totalorder %s597_s21, %s597_s21 }
  0x1b   :  { %p496_p11 = scmp.ne.s32.totalorder %s597_s21, %s495_s16  ;;  %p501_p13 = scmp.lt.s32.totalorder %s495_s16, %s495_s16 }
  0x1d   :  { %p502_p0 = por %p501_p13, %p500_p12 }
  0x1f   :  { %p503_p1 = pnand %p502_p0, %p496_p11 }
  0x21   :  { %506 = shalt.err (!%p503_p1)
}
  0x22   :  { %24 = dma.hbm_to_vmem [thread:$0]  %s667_s0, 128, %s597_s21, [#allocation4], %s559_s30, %s559_s30, %s560_s6  }
  0x23   :  { %s561_s18 = smov [#allocation8]   ;;  %s507_s23 = scalar_lea.hbm %s670_s3, 1024 }
  0x24   :  { %s44_s19 = sshll.u32 %s561_s18, 4  ;;  %p508_p2 = scmp.ne.s32.totalorder %s670_s3, %s507_s23  ;;  %s45_s19 = int_to_ptr.vmem [resolvable:$true] %s44_s19 }
  0x25   :  { %p511_p3 = scmp.lt.u32.totalorder %s507_s23, %s670_s3 }
  0x27   :  { %p513_p4 = pnand %p511_p3, %p508_p2 }
  0x29   :  { %516 = shalt.err (!%p513_p4)
}
  0x2a   :  { %s517_s28 = scalar_lea.vmem %s45_s19, 1024  ;;  %p522_p6 = scmp.lt.s32.totalorder %s45_s19, %s45_s19 }
  0x2b   :  { %p518_p5 = scmp.ne.s32.totalorder %s45_s19, %s517_s28  ;;  %p523_p7 = scmp.lt.s32.totalorder %s517_s28, %s517_s28 }
  0x2d   :  { %p524_p8 = por %p523_p7, %p522_p6 }
  0x2f   :  { %p525_p9 = pnand %p524_p8, %p518_p5 }
  0x31   :  { %528 = shalt.err (!%p525_p9)
}
  0x32   :  { %50 = dma.hbm_to_vmem [thread:$0]  %s670_s3, 1024, %s45_s19, [#allocation7], %s559_s30, %s559_s30, %s560_s6  }
  0x33   :  { %551 = dma.done.wait [#allocation4], 128  }
  0x34   :  { %552 = vsyncadd [#allocation4], 4294967168 }
  0x35   :  { %553 = dma.done.wait [#allocation7], 2048  }
  0x36   :  { %554 = vsyncadd [#allocation7], 4294965248  ;;  %v562_v0 = vmov 0.0   ;;  %vm563_vm0 = vmmov 0   ;;  %v438_v1 = vld [vmem:[#allocation6] sm:$0xff]   ;;  %v439_v2 = vld [vmem:[#allocation6 + $0x8] sm:$0xff]  }
  0x37   :  { %388 = vmatprep.subr.bf16.mxu0 %v562_v0  ;;  %404 = vmatprep.mubr.msk.bf16.mxu0 %vm563_vm0, %v562_v0  ;;  %v440_v3 = vld [vmem:[#allocation6 + $0x10] sm:$0xff]   ;;  %v447_v4 = vld [vmem:[#allocation8] sm:$0xff]   ;;  %v441_v5 = vld [vmem:[#allocation6 + $0x18] sm:$0xff]  }
  0x38   :  { %408 = vmatprep.subr.bf16.mxu1 %v562_v0  ;;  %424 = vmatprep.mubr.msk.bf16.mxu1 %vm563_vm0, %v562_v0  ;;  %v448_v6 = vld [vmem:[#allocation8 + $0x8] sm:$0xff]   ;;  %v442_v7 = vld [vmem:[#allocation6 + $0x20] sm:$0xff]   ;;  %v449_v8 = vld [vmem:[#allocation8 + $0x10] sm:$0xff]  }
  0x39   :  { %389 = vmatpush3.bf16.msra.mxu0 %v438_v1  ;;  %409 = vmatpush3.bf16.msra.mxu1 %v447_v4  ;;  %v443_v9 = vld [vmem:[#allocation6 + $0x28] sm:$0xff]   ;;  %v450_v10 = vld [vmem:[#allocation8 + $0x18] sm:$0xff]   ;;  %v444_v11 = vld [vmem:[#allocation6 + $0x30] sm:$0xff]  }
  0x3a   :  { %390 = vmatprep.subr.bf16.mxu0 %v562_v0  ;;  %410 = vmatprep.subr.bf16.mxu1 %v562_v0  ;;  %v451_v12 = vld [vmem:[#allocation8 + $0x20] sm:$0xff]   ;;  %v445_v13 = vld [vmem:[#allocation6 + $0x38] sm:$0xff]   ;;  %v452_v14 = vld [vmem:[#allocation8 + $0x28] sm:$0xff]  }
  0x3b   :  { %v446_v15 = vld [vmem:[#allocation3] sm:$0xff]   ;;  %v453_v16 = vld [vmem:[#allocation8 + $0x30] sm:$0xff]  }
  0x3c   :  { %v454_v17 = vld [vmem:[#allocation8 + $0x38] sm:$0xff]  }
  0x3d   :  { %391 = vmatpush3.bf16.msra.mxu0 %v439_v2  ;;  %411 = vmatpush3.bf16.msra.mxu1 %v448_v6  ;;  %v349_v18 = vld [vmem:[%s669_s2] ss:$0 sm:$0xff]  ;;  %s564_s2 = smov [#allocation9]  }
  0x3e   :  { %392 = vmatprep.subr.bf16.mxu0 %v562_v0  ;;  %412 = vmatprep.subr.bf16.mxu1 %v562_v0  ;;  %v367_v28 = vld [vmem:[%s671_s4] ss:$0 sm:$0xff]  ;;  %s336_s7 = sshll.u32 %s564_s2, 4  ;;  %s337_s7 = int_to_ptr.vmem [resolvable:$true] %s336_s7 }
  0x3f   :  { %s529_s4 = scalar_lea.vmem %s337_s7, 256  ;;  %p534_p11 = scmp.lt.s32.totalorder %s337_s7, %s337_s7 }
  0x40   :  { %p530_p10 = scmp.ne.s32.totalorder %s337_s7, %s529_s4  ;;  %p535_p12 = scmp.lt.s32.totalorder %s529_s4, %s529_s4 }
  0x41   :  { %393 = vmatpush3.bf16.msra.mxu0 %v440_v3  ;;  %413 = vmatpush3.bf16.msra.mxu1 %v449_v8 }
  0x42   :  { %394 = vmatprep.subr.bf16.mxu0 %v562_v0  ;;  %414 = vmatprep.subr.bf16.mxu1 %v562_v0  ;;  %p536_p13 = por %p535_p12, %p534_p11 }
  0x44   :  { %p537_p0 = pnand %p536_p13, %p530_p10 }
  0x45   :  { %395 = vmatpush3.bf16.msra.mxu0 %v441_v5  ;;  %415 = vmatpush3.bf16.msra.mxu1 %v450_v10 }
  0x46   :  { %396 = vmatprep.subr.bf16.mxu0 %v562_v0  ;;  %416 = vmatprep.subr.bf16.mxu1 %v562_v0 }
  0x49   :  { %397 = vmatpush3.bf16.msra.mxu0 %v442_v7  ;;  %417 = vmatpush3.bf16.msra.mxu1 %v451_v12 }
  0x4a   :  { %398 = vmatprep.subr.bf16.mxu0 %v562_v0  ;;  %418 = vmatprep.subr.bf16.mxu1 %v562_v0 }
  0x4d   :  { %399 = vmatpush3.bf16.msra.mxu0 %v443_v9  ;;  %419 = vmatpush3.bf16.msra.mxu1 %v452_v14 }
  0x4e   :  { %400 = vmatprep.subr.bf16.mxu0 %v562_v0  ;;  %420 = vmatprep.subr.bf16.mxu1 %v562_v0 }
  0x51   :  { %401 = vmatpush3.bf16.msra.mxu0 %v444_v11  ;;  %421 = vmatpush3.bf16.msra.mxu1 %v453_v16 }
  0x52   :  { %402 = vmatprep.subr.bf16.mxu0 %v562_v0  ;;  %422 = vmatprep.subr.bf16.mxu1 %v562_v0 }
  0x55   :  { %403 = vmatpush3.bf16.msra.mxu0 %v445_v13  ;;  %423 = vmatpush3.bf16.msra.mxu1 %v454_v17 }
  0x58   :  { %405 = vmatmul.mubr.bf16.vlgmr.msra.gmra.mrb[0].mxu0 %v446_v15 }
 0x12b   :  { %v182_v19 = vpop.f32.mrb[0].mxu0 }
 0x12c   :  { %v183_v20 = vadd.f32 %v349_v18, %v182_v19  ;;  %v406_v21 = vpop.f32.mrb[1].mxu0 }
 0x12d   :  { %v185_v22 = vpop.f32.mrb[2].mxu0 }
 0x12e   :  { %v186_v23 = vadd.f32 %v349_v18, %v185_v22  ;;  %v407_v24 = vpop.f32.mrb[3].mxu0  ;;  %v189_v25 = vmax.f32 %v183_v20, 0.0 }
 0x130   :  { %v190_v26 = vmax.f32 %v186_v23, 0.0 }
 0x132   :  { %v193_v27 = vpack.c.bf16 %v190_v26, %v189_v25 }
 0x134   :  { %425 = vmatmul.mubr.bf16.vlgmr.msra.gmra.mrb[0].mxu1 %v193_v27 }
 0x207   :  { %v292_v29 = vpop.f32.mrb[0].mxu1 }
 0x208   :  { %v315_v30 = vadd.f32 %v367_v28, %v292_v29  ;;  %v426_v31 = vpop.f32.mrb[1].mxu1 }
 0x209   :  { %v295_v32 = vpop.f32.mrb[2].mxu1 }
 0x20a   :  { %v368_v33 = vmul.f32 -1.442695, %v315_v30  ;;  %v316_v34 = vadd.f32 %v367_v28, %v295_v32  ;;  %v427_v35 = vpop.f32.mrb[3].mxu1 }
 0x20c   :  { %455 = vpow2.f32 %v368_v33  ;;  %v369_v36 = vmul.f32 -1.442695, %v316_v34 }
 0x20e   :  { %457 = vpow2.f32 %v369_v36 }
 0x216   :  { %v456_v37 = vpop.eup %455 }
 0x217   :  { %v323_v38 = vadd.f32 1.0, %v456_v37 }
 0x218   :  { %v458_v39 = vpop.eup %457 }
 0x219   :  { %459 = vrcp.f32 %v323_v38  ;;  %v324_v40 = vadd.f32 1.0, %v458_v39 }
 0x21b   :  { %461 = vrcp.f32 %v324_v40 }
 0x223   :  { %v460_v41 = vpop.eup %459 }
 0x224   :  { %329 = vst [vmem:[#allocation9] sm:$0xff] %v460_v41 }
 0x225   :  { %v462_v42 = vpop.eup %461 }
 0x226   :  { %330 = vst [vmem:[#allocation9 + $0x8] sm:$0xff] %v462_v42 }
 0x227   :  { %540 = shalt.err (!%p537_p0)
}
 0x228   :  { %s541_s10 = scalar_lea.hbm %s672_s5, 256 }
 0x229   :  { %p542_p1 = scmp.ne.s32.totalorder %s672_s5, %s541_s10  ;;  %p545_p2 = scmp.lt.u32.totalorder %s541_s10, %s672_s5 }
 0x22b   :  { %p547_p3 = pnand %p545_p2, %p542_p1 }
 0x22d   :  { %550 = shalt.err (!%p547_p3)
}
 0x22e   :  { %s565_s15 = smov 128   ;;  %s566_s16 = smov 8  }
 0x22f   :  { %342 = dma.vmem_to_hbm [thread:$0]  %s337_s7, 256, %s672_s5, [#allocation5], %s565_s15, %s565_s15, %s566_s16  }
 0x230   :  { %555 = dma.done.wait [#allocation5], 256  }
 0x231   :  { %556 = vsyncadd [#allocation5], 4294967040 }
 0x232   :  { %346 = vsyncpa [#allocation4], 1 }
 0x233   :  { %347 = vsyncpa [#allocation7], 1 }
 0x234   :  { %348 = vsyncpa [#allocation5], 1 }

</bundles_post_ra>
